<compile_context>
chip_gen: v7x
topology: tpu7x:2x2x1
jax: 0.10.0
libtpu: 0.0.40
codegen_flags: <defaults>
</compile_context>

<pallas_src>
import functools

import jax
import jax.numpy as jnp
from jax import lax
from jax.experimental import pallas as pl
from jax.experimental.pallas import tpu as pltpu

_LANES = 128
_MAX_BLOCK_ROWS = 2048   # 1 MiB per f32 block; fits v5e's 16 MiB scoped VMEM
_NUM_SPLITS_MAX = 2      # leading "parallel" axis -> both TCs on v7x


def _round_up(x: int, m: int) -> int:
    return ((x + m - 1) // m) * m


def _rmse_partial_kernel(yhat_ref, y_ref, out_ref, acc_ref, *,
                         block_rows, steps, valid_rows, need_mask):
    c = pl.program_id(0)          # split (parallel) axis
    i = pl.program_id(1)          # sequential reduction axis

    @pl.when(i == 0)
    def _init():
        acc_ref[...] = jnp.zeros_like(acc_ref)

    d = yhat_ref[...].astype(jnp.float32) - y_ref[...].astype(jnp.float32)
    sq = d * d

    if need_mask:
        # Zero contributions from rows past the end of the (un-padded) array.
        row0 = (c * steps + i) * block_rows
        rid = row0 + lax.broadcasted_iota(jnp.int32, sq.shape, 0)
        sq = jnp.where(rid < valid_rows, sq, 0.0)

    acc_ref[...] += sq            # pure VPU stream, hides under the DMA

    @pl.when(i == pl.num_programs(1) - 1)
    def _finalize():
        # One cross-sublane reduce per split; lanes are reduced in the wrapper.
        out_ref[...] = jnp.sum(acc_ref[...], axis=0, keepdims=True)[None]


def rmse_loss(yhat: jax.Array, y: jax.Array) -> jax.Array:
    assert yhat.shape == y.shape, "yhat and y must have identical shapes"
    total_elems = yhat.size

    # Native dtype in, no wrapper-side upcast (kernel is HBM-bandwidth bound).
    yhat_f = yhat.reshape(-1)
    y_f = y.reshape(-1)

    # Sublane alignment of the block row count depends on the packed dtype.
    itemsize = min(yhat_f.dtype.itemsize, y_f.dtype.itemsize)
    sub = max(8, 32 // max(itemsize, 1))   # f32->8, bf16->16, int8/fp8->32

    rows = pl.cdiv(total_elems, _LANES)

    if rows <= _MAX_BLOCK_ROWS:
        # Small input: one block that exactly covers a (slightly) padded array.
        block_rows = max(_round_up(rows, sub), sub)
        padded_rows = block_rows
    else:
        # Large input: fixed multi-MiB blocks; ragged last block masked in-kernel,
        # so no whole-array jnp.pad copy is needed (except the <128-elem tail).
        block_rows = _MAX_BLOCK_ROWS
        padded_rows = rows

    padded_n = padded_rows * _LANES
    if padded_n != total_elems:
        # Pad only the flat tail (zeros contribute 0 to the squared-diff sum).
        yhat_f = jnp.pad(yhat_f, (0, padded_n - total_elems))
        y_f = jnp.pad(y_f, (0, padded_n - total_elems))
    yhat2d = yhat_f.reshape(padded_rows, _LANES)
    y2d = y_f.reshape(padded_rows, _LANES)

    num_blocks = pl.cdiv(padded_rows, block_rows)
    num_splits = _NUM_SPLITS_MAX if num_blocks >= _NUM_SPLITS_MAX else 1
    steps = pl.cdiv(num_blocks, num_splits)
    need_mask = (num_splits * steps * block_rows) != padded_rows

    def in_index_map(c, i):
        blk = c * steps + i
        # Clamp the (at most one) fully out-of-range block index; its data is
        # zero-masked inside the kernel anyway.
        return (jnp.minimum(blk, num_blocks - 1), 0)

    kernel = functools.partial(
        _rmse_partial_kernel,
        block_rows=block_rows,
        steps=steps,
        valid_rows=padded_rows,
        need_mask=need_mask,
    )

    bytes_in = total_elems * (yhat.dtype.itemsize + y.dtype.itemsize)
    partials = pl.pallas_call(
        kernel,
        out_shape=jax.ShapeDtypeStruct((num_splits, 1, _LANES), jnp.float32),
        grid_spec=pltpu.PrefetchScalarGridSpec(
            num_scalar_prefetch=0,
            grid=(num_splits, steps),
            in_specs=[
                pl.BlockSpec((block_rows, _LANES), in_index_map),
                pl.BlockSpec((block_rows, _LANES), in_index_map),
            ],
            out_specs=pl.BlockSpec((1, 1, _LANES), lambda c, i: (c, 0, 0)),
            scratch_shapes=[pltpu.VMEM((block_rows, _LANES), jnp.float32)],
        ),
        compiler_params=pltpu.CompilerParams(
            dimension_semantics=("parallel", "arbitrary"),
        ),
        cost_estimate=pl.CostEstimate(
            flops=3 * total_elems,
            transcendentals=0,
            bytes_accessed=bytes_in + num_splits * _LANES * 4,
        ),
    )(yhat2d, y2d)

    mse = jnp.sum(partials) / jnp.float32(total_elems)
    return jnp.sqrt(mse + jnp.float32(1e-6))   # 0-dim scalar, like torch


if __name__ == "__main__":
    key = jax.random.PRNGKey(0)
    k1, k2 = jax.random.split(key)

    # Small CNN-regression-like shape (NCHW).
    shape = (2, 4, 16, 16)
    yhat = jax.random.normal(k1, shape, dtype=jnp.float32)
    y = jax.random.normal(k2, shape, dtype=jnp.float32)
    loss = jax.block_until_ready(rmse_loss(yhat, y))
    ref = jnp.sqrt(jnp.mean((yhat - y) ** 2) + 1e-6)
    assert jnp.allclose(loss, ref, rtol=1e-5, atol=1e-6), (loss, ref)

    # Ragged shape -> exercises the flat-tail pad fallback.
    k3, k4 = jax.random.split(k2)
    shape_r = (3, 5, 7, 11)
    yhat_r = jax.random.normal(k3, shape_r, dtype=jnp.float32)
    y_r = jax.random.normal(k4, shape_r, dtype=jnp.float32)
    loss_r = jax.block_until_ready(rmse_loss(yhat_r, y_r))
    ref_r = jnp.sqrt(jnp.mean((yhat_r - y_r) ** 2) + 1e-6)
    assert jnp.allclose(loss_r, ref_r, rtol=1e-5, atol=1e-6), (loss_r, ref_r)

    # Larger shape -> exercises big blocks, dual-split grid, and in-kernel masking.
    k5, k6 = jax.random.split(k4)
    shape_b = (4, 9, 128, 128)   # 589824 elems -> 4608 rows -> 3 blocks of 2048
    yhat_b = jax.random.normal(k5, shape_b, dtype=jnp.float32)
    y_b = jax.random.normal(k6, shape_b, dtype=jnp.float32)
    loss_b = jax.block_until_ready(rmse_loss(yhat_b, y_b))
    ref_b = jnp.sqrt(jnp.mean((yhat_b - y_b) ** 2) + 1e-6)
    assert jnp.allclose(loss_b, ref_b, rtol=1e-4, atol=1e-5), (loss_b, ref_b)

    print("KERNEL_OK")
</pallas_src>

<mosaic_0001>
module attributes {stable_mosaic.version = 11 : i64} {
  func.func @_rmse_partial_kernel(%arg0: i32, %arg1: i32, %arg2: memref<16x128xf32, #tpu.memory_space<vmem>>, %arg3: memref<16x128xf32, #tpu.memory_space<vmem>>, %arg4: memref<1x1x128xf32, #tpu.memory_space<vmem>>, %arg5: memref<16x128xf32, #tpu.memory_space<vmem>>) attributes {dimension_semantics = [#tpu.dimension_semantics<parallel>, #tpu.dimension_semantics<arbitrary>], iteration_bounds = array<i64: 1, 1>, scalar_prefetch = 0 : i64, scratch_operands = 1 : i64, tpu.core_type = #tpu.core_type<tc>, window_params = [{transform_indices = @transform_0, window_bounds = array<i64: 16, 128>}, {transform_indices = @transform_1, window_bounds = array<i64: 16, 128>}, {transform_indices = @transform_2, window_bounds = array<i64: 1, 1, 128>}]} {
    %c0_i32 = arith.constant 0 : i32
    %0 = arith.cmpi eq, %arg1, %c0_i32 : i32
    %1 = arith.extui %0 : i1 to i32
    %c0_i32_0 = arith.constant 0 : i32
    %2 = arith.cmpi ne, %1, %c0_i32_0 : i32
    scf.if %2 {
      %cst = arith.constant 0.000000e+00 : f32
      %13 = vector.broadcast %cst : f32 to vector<16x128xf32>
      %c0_10 = arith.constant 0 : index
      %c0_11 = arith.constant 0 : index
      %14 = vector.load %arg5[%c0_10, %c0_11] : memref<16x128xf32, #tpu.memory_space<vmem>>, vector<16x128xf32>
      tpu.vector_store %arg5[%c0_10, %c0_11], %13 {strides = array<i32>} : memref<16x128xf32, #tpu.memory_space<vmem>>, vector<16x128xf32>,
    } else {
    }
    %c0 = arith.constant 0 : index
    %c0_1 = arith.constant 0 : index
    %3 = vector.load %arg2[%c0, %c0_1] : memref<16x128xf32, #tpu.memory_space<vmem>>, vector<16x128xf32>
    %c0_2 = arith.constant 0 : index
    %c0_3 = arith.constant 0 : index
    %4 = vector.load %arg3[%c0_2, %c0_3] : memref<16x128xf32, #tpu.memory_space<vmem>>, vector<16x128xf32>
    %5 = arith.subf %3, %4 : vector<16x128xf32>
    %6 = arith.mulf %5, %5 : vector<16x128xf32>
    %c0_4 = arith.constant 0 : index
    %c0_5 = arith.constant 0 : index
    %7 = vector.load %arg5[%c0_4, %c0_5] : memref<16x128xf32, #tpu.memory_space<vmem>>, vector<16x128xf32>
    %8 = arith.addf %7, %6 : vector<16x128xf32>
    %c0_6 = arith.constant 0 : index
    %c0_7 = arith.constant 0 : index
    %9 = vector.load %arg5[%c0_6, %c0_7] : memref<16x128xf32, #tpu.memory_space<vmem>>, vector<16x128xf32>
    tpu.vector_store %arg5[%c0_6, %c0_7], %8 {strides = array<i32>} : memref<16x128xf32, #tpu.memory_space<vmem>>, vector<16x128xf32>,
    %c0_i32_8 = arith.constant 0 : i32
    %10 = arith.cmpi eq, %arg1, %c0_i32_8 : i32
    %11 = arith.extui %10 : i1 to i32
    %c0_i32_9 = arith.constant 0 : i32
    %12 = arith.cmpi ne, %11, %c0_i32_9 : i32
    scf.if %12 {
      %c0_10 = arith.constant 0 : index
      %c0_11 = arith.constant 0 : index
      %13 = vector.load %arg5[%c0_10, %c0_11] : memref<16x128xf32, #tpu.memory_space<vmem>>, vector<16x128xf32>
      %cst = arith.constant dense<0.000000e+00> : vector<128xf32>
      %14 = vector.multi_reduction <add>, %13, %cst [0] : vector<16x128xf32> to vector<128xf32>
      %15 = vector.shape_cast %14 : vector<128xf32> to vector<1x128xf32>
      %16 = vector.shape_cast %15 : vector<1x128xf32> to vector<1x1x128xf32>
      %c0_12 = arith.constant 0 : index
      %c0_13 = arith.constant 0 : index
      %c0_14 = arith.constant 0 : index
      %17 = vector.load %arg4[%c0_12, %c0_13, %c0_14] : memref<1x1x128xf32, #tpu.memory_space<vmem>>, vector<1x1x128xf32>
      tpu.vector_store %arg4[%c0_12, %c0_13, %c0_14], %16 {strides = array<i32>} : memref<1x1x128xf32, #tpu.memory_space<vmem>>, vector<1x1x128xf32>,
    } else {
    }
    return
  }
  func.func @transform_0(%arg0: i32, %arg1: i32) -> (i32, i32) {
    %c1_i32 = arith.constant 1 : i32
    %0 = arith.muli %arg0, %c1_i32 : i32
    %1 = arith.addi %0, %arg1 : i32
    %c0_i32 = arith.constant 0 : i32
    %2 = arith.minsi %1, %c0_i32 : i32
    %c0_i32_0 = arith.constant 0 : i32
    %c0_i32_1 = arith.constant 0 : i32
    return %2, %c0_i32_0 : i32, i32
  }
  func.func @transform_1(%arg0: i32, %arg1: i32) -> (i32, i32) {
    %c1_i32 = arith.constant 1 : i32
    %0 = arith.muli %arg0, %c1_i32 : i32
    %1 = arith.addi %0, %arg1 : i32
    %c0_i32 = arith.constant 0 : i32
    %2 = arith.minsi %1, %c0_i32 : i32
    %c0_i32_0 = arith.constant 0 : i32
    %c0_i32_1 = arith.constant 0 : i32
    return %2, %c0_i32_0 : i32, i32
  }
  func.func @transform_2(%arg0: i32, %arg1: i32) -> (i32, i32, i32) {
    %c0_i32 = arith.constant 0 : i32
    %c0_i32_0 = arith.constant 0 : i32
    %c0_i32_1 = arith.constant 0 : i32
    return %arg0, %c0_i32, %c0_i32_0 : i32, i32, i32
  }
}

</mosaic_0001>

<bundles_post_ra>
// kernel: tpu_custom_call.1
= control target key start
LH: loop header
LB: loop body
LE: loop exit
PB: predicated region body
PF: predicated region fallthrough
CT: control target
= control target key end

     0   :  { %7 = vsyncpa [#allocation4], 0  ;;  %s246_s0 = inlined_call_operand.hbm [shape: f32[16,128], index: 0, kind: input, shape index: {}]   ;;  %s247_s1 = inlined_call_operand.hbm [shape: f32[16,128], index: 1, kind: input, shape index: {}]   ;;  %s248_s2 = inlined_call_operand.hbm [shape: f32[1,1,128], index: 2, kind: output, shape index: {}]  }
   0x1   :  { %8 = vsyncpa [#allocation7], 0 }
   0x2   :  { %9 = vsyncpa [#allocation5], 0  ;;  %s190_s9 = smov [#allocation3]   ;;  %s118_s13 = scalar_lea.hbm %s246_s0, 256 }
   0x3   :  { %s21_s10 = sshll.u32 %s190_s9, 4  ;;  %p119_p0 = scmp.ne.s32.totalorder %s246_s0, %s118_s13  ;;  %s22_s10 = int_to_ptr.vmem [resolvable:$true] %s21_s10 }
   0x4   :  { %p122_p1 = scmp.lt.u32.totalorder %s118_s13, %s246_s0 }
   0x6   :  { %p124_p2 = pnand %p122_p1, %p119_p0 }
   0x8   :  { %127 = shalt.err (!%p124_p2)
}
   0x9   :  { %s128_s18 = scalar_lea.vmem %s22_s10, 256  ;;  %p133_p4 = scmp.lt.s32.totalorder %s22_s10, %s22_s10 }
   0xa   :  { %p129_p3 = scmp.ne.s32.totalorder %s22_s10, %s128_s18  ;;  %p134_p5 = scmp.lt.s32.totalorder %s128_s18, %s128_s18 }
   0xc   :  { %p135_p6 = por %p134_p5, %p133_p4 }
   0xe   :  { %p136_p7 = pnand %p135_p6, %p129_p3 }
  0x10   :  { %139 = shalt.err (!%p136_p7)
}
  0x11   :  { %s191_s19 = smov 128   ;;  %s192_s20 = smov 8  }
  0x12   :  { %27 = dma.hbm_to_vmem [thread:$0]  %s246_s0, 256, %s22_s10, [#allocation4], %s191_s19, %s191_s19, %s192_s20  }
  0x13   :  { %s193_s23 = smov [#allocation6]   ;;  %s140_s27 = scalar_lea.hbm %s247_s1, 256 }
  0x14   :  { %s39_s24 = sshll.u32 %s193_s23, 4  ;;  %p141_p8 = scmp.ne.s32.totalorder %s247_s1, %s140_s27  ;;  %s40_s24 = int_to_ptr.vmem [resolvable:$true] %s39_s24 }
  0x15   :  { %p144_p9 = scmp.lt.u32.totalorder %s140_s27, %s247_s1 }
  0x17   :  { %p146_p10 = pnand %p144_p9, %p141_p8 }
  0x19   :  { %149 = shalt.err (!%p146_p10)
}
  0x1a   :  { %s150_s4 = scalar_lea.vmem %s40_s24, 256  ;;  %p155_p12 = scmp.lt.s32.totalorder %s40_s24, %s40_s24 }
  0x1b   :  { %p151_p11 = scmp.ne.s32.totalorder %s40_s24, %s150_s4  ;;  %p156_p13 = scmp.lt.s32.totalorder %s150_s4, %s150_s4 }
  0x1d   :  { %p157_p0 = por %p156_p13, %p155_p12 }
  0x1f   :  { %p158_p1 = pnand %p157_p0, %p151_p11 }
  0x21   :  { %161 = shalt.err (!%p158_p1)
}
  0x22   :  { %45 = dma.hbm_to_vmem [thread:$0]  %s247_s1, 256, %s40_s24, [#allocation7], %s191_s19, %s191_s19, %s192_s20  }
  0x23   :  { %184 = dma.done.wait [#allocation4], 256  }
  0x24   :  { %185 = vsyncadd [#allocation4], 4294967040 }
  0x25   :  { %186 = dma.done.wait [#allocation7], 256  }
  0x26   :  { %187 = vsyncadd [#allocation7], 4294967040  ;;  %v66_v0 = vld [vmem:[#allocation3] sm:$0xff]  ;;  %v67_v1 = vld [vmem:[#allocation3 + $0x8] sm:$0xff]  ;;  %s194_s6 = smov [#allocation8]  }
  0x27   :  { %v68_v2 = vld [vmem:[#allocation6] sm:$0xff]  ;;  %v69_v3 = vld [vmem:[#allocation6 + $0x8] sm:$0xff]  ;;  %s99_s7 = sshll.u32 %s194_s6, 4  ;;  %s100_s7 = int_to_ptr.vmem [resolvable:$true] %s99_s7 }
  0x28   :  { %v70_v4 = vsub.f32 %v66_v0, %v68_v2  ;;  %v71_v5 = vsub.f32 %v67_v1, %v69_v3  ;;  %s162_s1 = scalar_lea.vmem %s100_s7, 16  ;;  %s166_s8 = scalar_lea.vmem %s100_s7, 32 }
  0x29   :  { %p163_p2 = scmp.ne.s32.totalorder %s100_s7, %s162_s1  ;;  %p167_p3 = scmp.lt.s32.totalorder %s100_s7, %s100_s7 }
  0x2a   :  { %v72_v6 = vmul.f32 %v70_v4, %v70_v4  ;;  %v73_v7 = vmul.f32 %v71_v5, %v71_v5  ;;  %p168_p4 = scmp.lt.s32.totalorder %s166_s8, %s162_s1 }
  0x2c   :  { %v85_v8 = vadd.f32 %v73_v7, %v72_v6  ;;  %p169_p5 = por %p168_p4, %p167_p3 }
  0x2e   :  { %v86_v9 = vrot.slane %v85_v8, 4  ;;  %p170_p6 = pnand %p169_p5, %p163_p2 }
  0x30   :  { %v87_v10 = vadd.f32 %v86_v9, %v85_v8 }
  0x32   :  { %v88_v11 = vrot.slane %v87_v10, 2 }
  0x34   :  { %v89_v12 = vadd.f32 %v88_v11, %v87_v10 }
  0x36   :  { %v90_v13 = vrot.slane %v89_v12, 1 }
  0x38   :  { %v91_v14 = vadd.f32 %v90_v13, %v89_v12 }
  0x3a   :  { %92 = vst [vmem:[#allocation8] sm:$0x1] %v91_v14 }
  0x3b   :  { %173 = shalt.err (!%p170_p6)
}
  0x3c   :  { %s174_s11 = scalar_lea.hbm %s248_s2, 16 }
  0x3d   :  { %p175_p7 = scmp.ne.s32.totalorder %s248_s2, %s174_s11  ;;  %p178_p8 = scmp.lt.u32.totalorder %s174_s11, %s248_s2 }
  0x3f   :  { %p180_p9 = pnand %p178_p8, %p175_p7 }
  0x41   :  { %183 = shalt.err (!%p180_p9)
}
  0x42   :  { %102 = dma.vmem_to_hbm [thread:$0]  %s100_s7, 16, %s248_s2, [#allocation5]  }
  0x43   :  { %188 = dma.done.wait [#allocation5], 16  }
  0x44   :  { %189 = vsyncadd [#allocation5], 4294967280 }
  0x45   :  { %106 = vsyncpa [#allocation4], 1 }
  0x46   :  { %107 = vsyncpa [#allocation7], 1 }
  0x47   :  { %108 = vsyncpa [#allocation5], 1 }

</bundles_post_ra>
